<compile_context>
chip_gen: v5e
topology: v5e:2x2
jax: 0.10.0
libtpu: 0.0.40
codegen_flags: <defaults>
</compile_context>

<pallas_src>
import functools

import jax
import jax.numpy as jnp
import numpy as np
from jax.experimental import pallas as pl
from jax.experimental.pallas import tpu as pltpu


def _round_up(x: int, m: int) -> int:
    return (x + m - 1) // m * m


def _pad2d_cast(a, rows, cols, dtype):
    """Zero-pad a 2-D array to (rows, cols) and cast, as one fused expression."""
    r, c = a.shape
    if rows != r or cols != c:
        a = jnp.pad(a, ((0, rows - r), (0, cols - c)))
    if a.dtype != dtype:
        a = a.astype(dtype)
    return a


def _choose_class_tile(pC, pD, itemsize, budget_bytes):
    # Keep V^T fully VMEM-resident when it fits the budget; otherwise stream
    # it in lane-dense 512/256/128-wide class tiles (double-buffered).
    if pD * pC * itemsize <= budget_bytes:
        return pC
    for tc in (512, 256, 128):
        if 2 * pD * tc * itemsize <= budget_bytes:
            return tc
    return 128


def _wn_linear_kernel(x_ref, vt_ref, scale_ref, b_ref, o_ref):
    # x_ref: (TB, pD)  vt_ref: (pD, TC)  scale_ref/b_ref: (1, TC)  o_ref: (TB, TC)
    acc = jnp.dot(x_ref[...], vt_ref[...], preferred_element_type=jnp.float32)
    o_ref[...] = (acc * scale_ref[...] + b_ref[...]).astype(o_ref.dtype)


@functools.partial(jax.jit, static_argnames=("compute_dtype", "block_batch"))
def classifier_forward(x, v, g, b, *, compute_dtype=jnp.float32, block_batch=512):
    """x: (B, D); v: (C, D); g: (C,); b: (C,) -> (B, C) f32."""
    B, D = x.shape
    C = v.shape[0]
    itemsize = np.dtype(compute_dtype).itemsize

    # Lane-dense padding; sublane multiple depends on the streamed dtype
    # ((8,128) min tile for f32, (16,128) for bf16).
    sub = 16 if itemsize == 2 else 8
    pD = _round_up(D, 128)
    pC = _round_up(C, 128)
    pB = _round_up(B, sub)
    tb = _round_up(min(block_batch, pB), sub)
    pB = _round_up(pB, tb)

    # Class tiling only when a resident V^T would not fit a conservative VMEM
    # budget (sized so it also works within v7x's 64 MiB/TC).
    tc = _choose_class_tile(pC, pD, itemsize, budget_bytes=16 << 20)
    pC = _round_up(pC, tc)
    nb, nc = pB // tb, pC // tc

    # One-time prep (fused under jit): weight-norm scale, transposed V, pads,
    # and the dtype cast of the streamed operands.
    scale = (g / jnp.sqrt(jnp.sum(v * v, axis=1))).astype(jnp.float32)      # (C,)
    x_p = _pad2d_cast(x, pB, pD, compute_dtype)                             # (pB, pD)
    vt_p = _pad2d_cast(v.T, pD, pC, compute_dtype)                          # (pD, pC)
    scale_p = _pad2d_cast(scale.reshape(1, C), 1, pC, jnp.float32)          # (1, pC)
    b_p = _pad2d_cast(b.reshape(1, C), 1, pC, jnp.float32)                  # (1, pC)

    # V spec: constant index when fully resident -> single buffer is enough;
    # otherwise streamed class tiles with the default double buffering.
    if nc == 1:
        v_spec = pl.BlockSpec((pD, tc), lambda i, j: (0, j),
                              pipeline_mode=pl.Buffered(1))
        v_buffers = 1
    else:
        v_spec = pl.BlockSpec((pD, tc), lambda i, j: (0, j))
        v_buffers = 2

    vmem_needed = (
        v_buffers * pD * tc * itemsize        # V^T tile(s)
        + 2 * tb * pD * itemsize              # x (double-buffered)
        + 2 * tb * tc * 4                     # output (double-buffered, f32)
        + 4 * tc * 4                          # scale + bias (tiny)
    )
    vmem_limit = int(min(max(vmem_needed * 3 // 2 + (2 << 20), 32 << 20), 128 << 20))

    out = pl.pallas_call(
        _wn_linear_kernel,
        out_shape=jax.ShapeDtypeStruct((pB, pC), jnp.float32),
        grid=(nb, nc),
        in_specs=[
            pl.BlockSpec((tb, pD), lambda i, j: (i, 0)),   # activations: batch-tiled
            v_spec,                                        # V^T: resident / class-tiled
            pl.BlockSpec((1, tc), lambda i, j: (0, j)),    # precomputed weight-norm scale
            pl.BlockSpec((1, tc), lambda i, j: (0, j)),    # bias
        ],
        out_specs=pl.BlockSpec((tb, tc), lambda i, j: (i, j)),
        compiler_params=pltpu.CompilerParams(
            dimension_semantics=("parallel", "parallel"),
            vmem_limit_bytes=vmem_limit),
    )(x_p, vt_p, scale_p, b_p)

    return out[:B, :C]


def reference_forward(x, v, g, b):
    norm = jnp.sqrt(jnp.sum(v * v, axis=1, keepdims=True))    # (C, 1)
    w = v * (g[:, None] / norm)
    return x @ w.T + b[None, :]


if __name__ == "__main__":
    # Small shapes consistent with the module: Classifier(input_dim=32, n_classes=16)
    batch, input_dim, n_classes = 8, 32, 16

    key = jax.random.PRNGKey(0)
    kx, kv, kg, kb = jax.random.split(key, 4)

    x = jax.random.normal(kx, (batch, input_dim), dtype=jnp.float32)
    v = jax.random.normal(kv, (n_classes, input_dim), dtype=jnp.float32) * 0.1
    g = 1.0 + 0.05 * jax.random.normal(kg, (n_classes,), dtype=jnp.float32)
    b = 0.01 * jax.random.normal(kb, (n_classes,), dtype=jnp.float32)

    ref = reference_forward(x, v, g, b)

    # f32 path: exact-semantics check.
    out = jax.block_until_ready(
        classifier_forward(x, v, g, b, compute_dtype=jnp.float32))
    assert out.shape == (batch, n_classes)
    assert jnp.allclose(out, ref, atol=1e-5, rtol=1e-5), "f32 mismatch vs reference"

    # bf16-storage path (f32 accumulation): bandwidth-optimized variant.
    out_bf16 = jax.block_until_ready(
        classifier_forward(x, v, g, b, compute_dtype=jnp.bfloat16))
    assert jnp.allclose(out_bf16, ref, atol=5e-2, rtol=5e-2), "bf16 mismatch vs reference"

    print("KERNEL_OK")
</pallas_src>

<mosaic_0001>
module attributes {stable_mosaic.version = 11 : i64} {
  func.func @_wn_linear_kernel(%arg0: i32, %arg1: i32, %arg2: memref<8x128xf32, #tpu.memory_space<vmem>>, %arg3: memref<128x128xf32, #tpu.memory_space<vmem>>, %arg4: memref<1x128xf32, #tpu.memory_space<vmem>>, %arg5: memref<1x128xf32, #tpu.memory_space<vmem>>, %arg6: memref<8x128xf32, #tpu.memory_space<vmem>>) attributes {dimension_semantics = [#tpu.dimension_semantics<parallel>, #tpu.dimension_semantics<parallel>], iteration_bounds = array<i64: 1, 1>, scalar_prefetch = 0 : i64, scratch_operands = 0 : i64, tpu.core_type = #tpu.core_type<tc>, window_params = [{transform_indices = @transform_0, window_bounds = array<i64: 8, 128>}, {pipeline_mode = #tpu.pipeline_mode<synchronous>, transform_indices = @transform_1, window_bounds = array<i64: 128, 128>}, {transform_indices = @transform_2, window_bounds = array<i64: 1, 128>}, {transform_indices = @transform_3, window_bounds = array<i64: 1, 128>}, {transform_indices = @transform_4, window_bounds = array<i64: 8, 128>}]} {
    %c0 = arith.constant 0 : index
    %c0_0 = arith.constant 0 : index
    %0 = vector.load %arg2[%c0, %c0_0] : memref<8x128xf32, #tpu.memory_space<vmem>>, vector<8x128xf32>
    %c0_1 = arith.constant 0 : index
    %c0_2 = arith.constant 0 : index
    %1 = vector.load %arg3[%c0_1, %c0_2] : memref<128x128xf32, #tpu.memory_space<vmem>>, vector<128x128xf32>
    %cst = arith.constant dense<0.000000e+00> : vector<8x128xf32>
    %2 = tpu.matmul %0, %1, %cst {dimension_numbers = #tpu.dot_dimension_numbers<[1], [0], [0], [1], [0, 0, 1, 1], [], []>} : vector<8x128xf32>, vector<128x128xf32>, vector<8x128xf32> -> vector<8x128xf32>
    %c0_3 = arith.constant 0 : index
    %c0_4 = arith.constant 0 : index
    %3 = vector.load %arg4[%c0_3, %c0_4] : memref<1x128xf32, #tpu.memory_space<vmem>>, vector<1x128xf32>
    %4 = vector.broadcast %3 : vector<1x128xf32> to vector<8x128xf32>
    %5 = arith.mulf %2, %4 : vector<8x128xf32>
    %c0_5 = arith.constant 0 : index
    %c0_6 = arith.constant 0 : index
    %6 = vector.load %arg5[%c0_5, %c0_6] : memref<1x128xf32, #tpu.memory_space<vmem>>, vector<1x128xf32>
    %7 = vector.broadcast %6 : vector<1x128xf32> to vector<8x128xf32>
    %8 = arith.addf %5, %7 : vector<8x128xf32>
    %c0_7 = arith.constant 0 : index
    %c0_8 = arith.constant 0 : index
    %9 = vector.load %arg6[%c0_7, %c0_8] : memref<8x128xf32, #tpu.memory_space<vmem>>, vector<8x128xf32>
    tpu.vector_store %arg6[%c0_7, %c0_8], %8 {strides = array<i32>} : memref<8x128xf32, #tpu.memory_space<vmem>>, vector<8x128xf32>,
    return
  }
  func.func @transform_0(%arg0: i32, %arg1: i32) -> (i32, i32) {
    %c0_i32 = arith.constant 0 : i32
    %c0_i32_0 = arith.constant 0 : i32
    return %arg0, %c0_i32 : i32, i32
  }
  func.func @transform_1(%arg0: i32, %arg1: i32) -> (i32, i32) {
    %c0_i32 = arith.constant 0 : i32
    %c0_i32_0 = arith.constant 0 : i32
    return %c0_i32, %arg1 : i32, i32
  }
  func.func @transform_2(%arg0: i32, %arg1: i32) -> (i32, i32) {
    %c0_i32 = arith.constant 0 : i32
    %c0_i32_0 = arith.constant 0 : i32
    return %c0_i32, %arg1 : i32, i32
  }
  func.func @transform_3(%arg0: i32, %arg1: i32) -> (i32, i32) {
    %c0_i32 = arith.constant 0 : i32
    %c0_i32_0 = arith.constant 0 : i32
    return %c0_i32, %arg1 : i32, i32
  }
  func.func @transform_4(%arg0: i32, %arg1: i32) -> (i32, i32) {
    %c0_i32 = arith.constant 0 : i32
    return %arg0, %arg1 : i32, i32
  }
}

</mosaic_0001>

<bundles_post_ra>
// kernel: classifier_forward.1
= control target key start
LH: loop header
LB: loop body
LE: loop exit
PB: predicated region body
PF: predicated region fallthrough
CT: control target
= control target key end

     0   :  { %s197_s0 = inlined_call_operand.vmem [shape: f32[8,128], index: 0, kind: input, shape index: {}]   ;;  %s198_s1 = inlined_call_operand.vmem [shape: f32[128,128], index: 1, kind: input, shape index: {}]   ;;  %s199_s2 = inlined_call_operand.vmem [shape: f32[1,128], index: 2, kind: input, shape index: {}]   ;;  %s200_s3 = inlined_call_operand.vmem [shape: f32[1,128], index: 3, kind: input, shape index: {}]   ;;  %s201_s4 = inlined_call_operand.hbm [shape: f32[8,128], index: 4, kind: output, shape index: {}]  }
   0x1   :  { %v34_v0 = vld [vmem:[%s198_s1 + $0x78] sm:$0xff]  ;;  %v33_v1 = vld [vmem:[%s198_s1 + $0x70] sm:$0xff]  ;;  %v32_v2 = vld [vmem:[%s198_s1 + $0x68] sm:$0xff] }
   0x2   :  { %35 = vmatpush.msra.mxu0 %v34_v0  ;;  %v31_v3 = vld [vmem:[%s198_s1 + $0x60] sm:$0xff]  ;;  %v30_v4 = vld [vmem:[%s198_s1 + $0x58] sm:$0xff] }
   0x4   :  { %36 = vmatpush.msra.mxu0 %v33_v1 }
   0x6   :  { %37 = vmatpush.msra.mxu0 %v32_v2 }
   0x7   :  { %9 = vsyncpa [#allocation3], 0  ;;  %v29_v5 = vld [vmem:[%s198_s1 + $0x50] sm:$0xff]  ;;  %v28_v6 = vld [vmem:[%s198_s1 + $0x48] sm:$0xff]  ;;  %s111_s27 = smov [#allocation2]   ;;  %s73_s30 = sshll.u32 %s201_s4, 4  ;;  %s74_s30 = int_to_ptr.hbm [resolvable:$true] %s73_s30 }
   0x8   :  { %38 = vmatpush.msra.mxu0 %v31_v3  ;;  %v27_v7 = vld [vmem:[%s198_s1 + $0x40] sm:$0xff]  ;;  %v26_v8 = vld [vmem:[%s198_s1 + $0x38] sm:$0xff]  ;;  %v25_v9 = vld [vmem:[%s198_s1 + $0x30] sm:$0xff]  ;;  %s71_s28 = sshll.u32 %s111_s27, 4  ;;  %s72_s28 = int_to_ptr.vmem [resolvable:$true] %s71_s28 }
   0x9   :  { %v24_v10 = vld [vmem:[%s198_s1 + $0x28] sm:$0xff]  ;;  %v23_v11 = vld [vmem:[%s198_s1 + $0x20] sm:$0xff]  ;;  %v22_v12 = vld [vmem:[%s198_s1 + $0x18] sm:$0xff] }
   0xa   :  { %39 = vmatpush.msra.mxu0 %v30_v4  ;;  %v21_v13 = vld [vmem:[%s198_s1 + $0x10] sm:$0xff]  ;;  %v20_v14 = vld [vmem:[%s198_s1 + $0x8] sm:$0xff]  ;;  %v19_v15 = vld [vmem:[%s198_s1] sm:$0xff] }
   0xb   :  { %v18_v16 = vld [vmem:[%s197_s0] sm:$0xff] }
   0xc   :  { %40 = vmatpush.msra.mxu0 %v29_v5  ;;  %v83_v17 = vld [vmem:[%s199_s2] ss:$0 sm:$0xff] }
   0xd   :  { %v84_v18 = vld [vmem:[%s200_s3] ss:$0 sm:$0xff] }
   0xe   :  { %41 = vmatpush.msra.mxu0 %v28_v6 }
  0x10   :  { %42 = vmatpush.msra.mxu0 %v27_v7 }
  0x12   :  { %43 = vmatpush.msra.mxu0 %v26_v8 }
  0x14   :  { %44 = vmatpush.msra.mxu0 %v25_v9 }
  0x16   :  { %45 = vmatpush.msra.mxu0 %v24_v10 }
  0x18   :  { %46 = vmatpush.msra.mxu0 %v23_v11 }
  0x1a   :  { %47 = vmatpush.msra.mxu0 %v22_v12 }
  0x1c   :  { %48 = vmatpush.msra.mxu0 %v21_v13 }
  0x1e   :  { %49 = vmatpush.msra.mxu0 %v20_v14 }
  0x20   :  { %50 = vmatpush.msra.mxu0 %v19_v15 }
  0x21   :  { %51 = vmatmul.f32.vlgmr.msra.gmra.mxu0 %v18_v16 }
  0x9e   :  { %v52_v19 = vpop.f32.mrf.mxu0 }
  0x9f   :  { %v59_v20 = vmul.f32 %v83_v17, %v52_v19 }
  0xa1   :  { %v64_v21 = vadd.f32 %v84_v18, %v59_v20 }
  0xa3   :  { %65 = vst [vmem:[#allocation2] sm:$0xff] %v64_v21 }
  0xa4   :  { %76 = dma.vmem_to_hbm [thread:$0]  %s72_s28, 128, %s74_s30, [#allocation3]  }
  0xa5   :  { %109 = dma.done.wait [#allocation3], 128  }
  0xa6   :  { %110 = vsyncadd [#allocation3], 4294967168 }
  0xa7   :  { %81 = vsyncpa [#allocation3], 1 }

</bundles_post_ra>
